<compile_context>
chip_gen: v6e
topology: v6e:2x2x1
jax: 0.10.0
libtpu: 0.0.40
codegen_flags: <defaults>
</compile_context>

<pallas_src>
import functools

import jax
import jax.numpy as jnp
from jax.experimental import pallas as pl
from jax.experimental.pallas import tpu as pltpu


def _mhdiff_kernel(lam_ref, x_ref, wqkv_ref, bqkv_ref, wvof_ref, ball_ref,
                   o_ref, acc_ref, *, seq_len, d_model, batch_tile):
    """One (batch-tile, head) grid step: per-head diff-attention, accumulated."""
    h = pl.program_id(1)

    @pl.when(h == 0)
    def _init():
        acc_ref[...] = jnp.zeros_like(acc_ref)

    x = x_ref[...]                          # (Bt*S, D) bf16
    D = d_model
    S = seq_len
    dq = D // 2                             # width of each Q1/Q2/K1/K2 chunk

    # Per-head fused projections (scale pre-folded into the Q columns of wqkv/bqkv).
    # qkv stays only (Bt*S, 2*D) f32 per step (heads are on the grid), and the
    # bf16 casts happen on the per-element slices below (proven lowering path).
    qkv = jnp.dot(x, wqkv_ref[0], preferred_element_type=jnp.float32) + bqkv_ref[0]
    # Folded value/inner-out/outer-out projection of x for this head: (Bt*S, D)
    xw = jnp.dot(x, wvof_ref[0], preferred_element_type=jnp.float32)

    lam = lam_ref[h]                        # per-head lambda_final (SMEM scalar)
    dn = (((1,), (1,)), ((), ()))           # contract last dims -> Q @ K^T

    for b in range(batch_tile):             # static, small unroll over packed batch
        r0 = b * S
        q1 = qkv[r0:r0 + S, 0 * dq:1 * dq].astype(jnp.bfloat16)
        q2 = qkv[r0:r0 + S, 1 * dq:2 * dq].astype(jnp.bfloat16)
        k1 = qkv[r0:r0 + S, 2 * dq:3 * dq].astype(jnp.bfloat16)
        k2 = qkv[r0:r0 + S, 3 * dq:4 * dq].astype(jnp.bfloat16)
        xw_b = xw[r0:r0 + S, :].astype(jnp.bfloat16)

        a1 = jax.lax.dot_general(q1, k1, dn, preferred_element_type=jnp.float32)
        a2 = jax.lax.dot_general(q2, k2, dn, preferred_element_type=jnp.float32)

        e1 = jnp.exp(a1 - jnp.max(a1, axis=-1, keepdims=True))
        e2 = jnp.exp(a2 - jnp.max(a2, axis=-1, keepdims=True))
        inv1 = pl.reciprocal(jnp.sum(e1, axis=-1, keepdims=True), approx=True)
        # lambda folded into the (S,1) reciprocal instead of scaling the (S,S) matrix
        inv2 = lam * pl.reciprocal(jnp.sum(e2, axis=-1, keepdims=True), approx=True)
        diff = e1 * inv1 - e2 * inv2        # cancellation-prone combine kept in f32

        acc_ref[r0:r0 + S, :] += jnp.dot(diff.astype(jnp.bfloat16), xw_b,
                                         preferred_element_type=jnp.float32)

    @pl.when(h == pl.num_programs(1) - 1)
    def _finalize():
        # folded bias: bf + sum_h ((1 - lam_h) * bv_h Wo_h + bo_h) Wf_h
        o_ref[...] = (acc_ref[...] + ball_ref[...]).astype(o_ref.dtype)


def _pick_batch_tile(B, S):
    """Largest divisor of B keeping the packed projection M-dim <= 512 rows."""
    bt = 1
    for c in range(1, B + 1):
        if B % c == 0 and c * S <= 512:
            bt = c
    return bt


def _pick_vmem_limit():
    """Generation-aware scoped-VMEM limit with headroom (cap ~100 MiB)."""
    cap = 64 * 1024 * 1024                  # conservative fallback (v7x per-core VMEM)
    try:
        cap = int(getattr(pltpu.get_tpu_info(), "vmem_capacity_bytes", cap))
    except Exception:
        pass
    return int(min(cap * 3 // 4, 100 * 1024 * 1024))


def multi_head_differential_attention(x, params, *, batch_tile=None,
                                       out_dtype=jnp.bfloat16):
    """Eval-mode forward of MultiHeadDifferentialAttention as one fused pallas_call."""
    B, S, D = x.shape
    H = params["wqkv"].shape[0]
    head_dim = D // H
    dq = D // 2
    lam = params["lam"]                                                  # (H,)

    # ---- exact eval-mode weight folding (one-time, at weight-load) ----
    scale = 1.0 / (head_dim ** 0.5)
    # fold 1/sqrt(head_dim) into the Q1/Q2 columns of the qkv weight and bias
    qscale = jnp.concatenate([jnp.full((2 * dq,), scale, jnp.float32),
                              jnp.ones((2 * dq,), jnp.float32)])         # (2D,)
    wqkv = params["wqkv"] * qscale[None, None, :]                        # (H, D, 2D)
    bqkv = params["bqkv"] * qscale[None, None, :]                        # (H, 1, 2D)

    wvo = jnp.einsum("hdk,hko->hdo", params["wv"], params["wo"])         # (H, D, D)
    bvo = jnp.einsum("hik,hko->hio", params["bv"], params["wo"])         # (H, 1, D)
    wf_h = params["wf"].reshape(H, D, D)                                 # per-head outer proj
    wvof = jnp.einsum("hdo,hop->hdp", wvo, wf_h)                         # (H, D, D)
    bias_h = (1.0 - lam)[:, None, None] * bvo + params["bo"]             # (H, 1, D)
    b_all = params["bf"] + jnp.einsum("hio,hop->ip", bias_h, wf_h)       # (1, D)

    if batch_tile is None:
        batch_tile = _pick_batch_tile(B, S)
    assert B % batch_tile == 0
    Bt = batch_tile
    rows = Bt * S

    # bf16 MXU operands (f32 accumulation inside the kernel); flat (B*S, D) layout
    # so the kernel never needs an in-kernel reshape.
    x_flat = x.reshape(B * S, D).astype(jnp.bfloat16)
    wqkv_b16 = wqkv.astype(jnp.bfloat16)
    wvof_b16 = wvof.astype(jnp.bfloat16)

    kernel = functools.partial(_mhdiff_kernel, seq_len=S, d_model=D,
                               batch_tile=Bt)

    flops = int(B * H * (2 * S * D * (2 * D)     # per-head qkv projection
                         + 2 * S * D * D         # folded value/out/outer projection
                         + 2 * 2 * S * S * dq    # two score matmuls
                         + 2 * S * S * D))       # value matmul
    transcendentals = int(2 * B * H * S * S)
    out_itemsize = jnp.dtype(out_dtype).itemsize
    bytes_accessed = int(x_flat.size * 2
                         + (B // Bt) * (wqkv_b16.size + wvof_b16.size) * 2
                         + (B // Bt) * (bqkv.size + b_all.size) * 4
                         + B * S * D * out_itemsize)

    out_flat = pl.pallas_call(
        kernel,
        out_shape=jax.ShapeDtypeStruct((B * S, D), out_dtype),
        grid=(B // Bt, H),
        in_specs=[
            pl.BlockSpec(memory_space=pltpu.MemorySpace.SMEM),           # lam (H,)
            pl.BlockSpec((rows, D), lambda bt, h: (bt, 0)),              # x (bf16, packed batch)
            pl.BlockSpec((1, D, 2 * D), lambda bt, h: (h, 0, 0)),        # wqkv   (per-head slab)
            pl.BlockSpec((1, 1, 2 * D), lambda bt, h: (h, 0, 0)),        # bqkv   (per-head)
            pl.BlockSpec((1, D, D), lambda bt, h: (h, 0, 0)),            # wvof   (per-head, folded)
            pl.BlockSpec((1, D), lambda bt, h: (0, 0)),                  # folded output bias
        ],
        out_specs=pl.BlockSpec((rows, D), lambda bt, h: (bt, 0)),
        scratch_shapes=[pltpu.VMEM((rows, D), jnp.float32)],             # head accumulator
        compiler_params=pltpu.CompilerParams(
            dimension_semantics=("parallel", "arbitrary"),
            vmem_limit_bytes=_pick_vmem_limit()),
        cost_estimate=pl.CostEstimate(flops=flops,
                                      transcendentals=transcendentals,
                                      bytes_accessed=bytes_accessed),
    )(lam, x_flat, wqkv_b16, bqkv, wvof_b16, b_all)

    return out_flat.reshape(B, S, D)


def init_params(key, d_model, n_heads, lambda_init=0.5, layer_index=0):
    """Deterministic synthetic parameters matching the module's shapes."""
    H, D = n_heads, d_model
    head_dim = D // H
    DV = 2 * D * H
    ks = jax.random.split(key, 12)

    def u(k, shape, fan_in):
        bound = 1.0 / (fan_in ** 0.5)
        return jax.random.uniform(k, shape, jnp.float32, -bound, bound)

    wqkv = u(ks[0], (H, D, 2 * D), D)        # per-head qkv_proj
    bqkv = u(ks[1], (H, 1, 2 * D), D)
    wv = u(ks[2], (H, D, DV), D)             # per-head value_proj
    bv = u(ks[3], (H, 1, DV), D)
    wo = u(ks[4], (H, DV, D), DV)            # per-head (inner) out_proj
    bo = u(ks[5], (H, 1, D), DV)
    wf = u(ks[6], (H * D, D), H * D)         # outer out_proj
    bf = u(ks[7], (1, D), H * D)

    lq1 = 0.3 * jax.random.normal(ks[8], (H, head_dim), jnp.float32)
    lk1 = 0.3 * jax.random.normal(ks[9], (H, head_dim), jnp.float32)
    lq2 = 0.3 * jax.random.normal(ks[10], (H, head_dim), jnp.float32)
    lk2 = 0.3 * jax.random.normal(ks[11], (H, head_dim), jnp.float32)
    lambda_decay = lambda_init - 0.6 * jnp.exp(jnp.float32(-0.3 * layer_index))
    lam = (jnp.exp(jnp.sum(lq1 * lk1, axis=-1))
           - jnp.exp(jnp.sum(lq2 * lk2, axis=-1)) + lambda_decay)   # (H,) lambda_final

    return dict(wqkv=wqkv, bqkv=bqkv, wv=wv, bv=bv, wo=wo, bo=bo,
                wf=wf, bf=bf, lam=lam.astype(jnp.float32))


def reference(x, params):
    """Pure-JAX reference mirroring the PyTorch forward (eval mode, no mask)."""
    B, S, D = x.shape
    H = params["wqkv"].shape[0]
    head_dim = D // H
    outs = []
    for h in range(H):
        qkv = x @ params["wqkv"][h] + params["bqkv"][h]
        dq = qkv.shape[-1] // 4
        q1, q2 = qkv[..., :dq], qkv[..., dq:2 * dq]
        k1, k2 = qkv[..., 2 * dq:3 * dq], qkv[..., 3 * dq:]
        v = x @ params["wv"][h] + params["bv"][h]
        a1 = jax.nn.softmax(jnp.einsum("bqd,bkd->bqk", q1, k1) / head_dim ** 0.5, axis=-1)
        a2 = jax.nn.softmax(jnp.einsum("bqd,bkd->bqk", q2, k2) / head_dim ** 0.5, axis=-1)
        diff = a1 - params["lam"][h] * a2
        o = jnp.einsum("bqk,bkd->bqd", diff, v)
        outs.append(o @ params["wo"][h] + params["bo"][h])
    concat = jnp.concatenate(outs, axis=-1)
    return concat @ params["wf"] + params["bf"]


if __name__ == "__main__":
    B, S, D, H = 2, 8, 32, 4   # batch, seq, d_model, n_heads  (head_dim = 8)
    key = jax.random.PRNGKey(0)
    kx, kp = jax.random.split(key)
    x = jax.random.normal(kx, (B, S, D), jnp.float32)
    params = init_params(kp, D, H, lambda_init=0.5, layer_index=0)

    y = multi_head_differential_attention(x, params)
    y = jax.block_until_ready(y)

    y_ref = reference(x, params)
    assert y.shape == (B, S, D), y.shape
    y_f32 = y.astype(jnp.float32)
    max_err = float(jnp.max(jnp.abs(y_f32 - y_ref)))
    assert jnp.allclose(y_f32, y_ref, atol=3e-2, rtol=3e-2), f"max_err={max_err}"
    print("KERNEL_OK")
</pallas_src>

<mosaic_0001>
module attributes {stable_mosaic.version = 11 : i64} {
  func.func @_mhdiff_kernel(%arg0: i32, %arg1: i32, %arg2: memref<4xf32, #tpu.memory_space<smem>>, %arg3: memref<16x32xbf16, #tpu.memory_space<vmem>>, %arg4: memref<1x32x64xbf16, #tpu.memory_space<vmem>>, %arg5: memref<1x1x64xf32, #tpu.memory_space<vmem>>, %arg6: memref<1x32x32xbf16, #tpu.memory_space<vmem>>, %arg7: memref<1x32xf32, #tpu.memory_space<vmem>>, %arg8: memref<16x32xbf16, #tpu.memory_space<vmem>>, %arg9: memref<16x32xf32, #tpu.memory_space<vmem>>) attributes {dimension_semantics = [#tpu.dimension_semantics<parallel>, #tpu.dimension_semantics<arbitrary>], iteration_bounds = array<i64: 1, 4>, scalar_prefetch = 0 : i64, scratch_operands = 1 : i64, tpu.core_type = #tpu.core_type<tc>, window_params = [{transform_indices = @transform_0, window_bounds = array<i64: 4>}, {transform_indices = @transform_1, window_bounds = array<i64: 16, 32>}, {transform_indices = @transform_2, window_bounds = array<i64: 1, 32, 64>}, {transform_indices = @transform_3, window_bounds = array<i64: 1, 1, 64>}, {transform_indices = @transform_4, window_bounds = array<i64: 1, 32, 32>}, {pipeline_mode = #tpu.pipeline_mode<synchronous>, transform_indices = @transform_5, window_bounds = array<i64: 1, 32>}, {transform_indices = @transform_6, window_bounds = array<i64: 16, 32>}]} {
    %c0_i32 = arith.constant 0 : i32
    %0 = arith.cmpi eq, %arg1, %c0_i32 : i32
    %1 = arith.extui %0 : i1 to i32
    %c0_i32_0 = arith.constant 0 : i32
    %2 = arith.cmpi ne, %1, %c0_i32_0 : i32
    scf.if %2 {
      %cst_34 = arith.constant 0.000000e+00 : f32
      %99 = vector.broadcast %cst_34 : f32 to vector<16x32xf32>
      %c0_35 = arith.constant 0 : index
      %c0_36 = arith.constant 0 : index
      %100 = vector.load %arg9[%c0_35, %c0_36] : memref<16x32xf32, #tpu.memory_space<vmem>>, vector<16x32xf32>
      tpu.vector_store %arg9[%c0_35, %c0_36], %99 {strides = array<i32>} : memref<16x32xf32, #tpu.memory_space<vmem>>, vector<16x32xf32>,
    } else {
    }
    %c0 = arith.constant 0 : index
    %c0_1 = arith.constant 0 : index
    %3 = vector.load %arg3[%c0, %c0_1] : memref<16x32xbf16, #tpu.memory_space<vmem>>, vector<16x32xbf16>
    %c0_2 = arith.constant 0 : index
    %c0_3 = arith.constant 0 : index
    %c0_4 = arith.constant 0 : index
    %4 = vector.load %arg4[%c0_2, %c0_3, %c0_4] : memref<1x32x64xbf16, #tpu.memory_space<vmem>>, vector<1x32x64xbf16>
    %5 = vector.shape_cast %4 : vector<1x32x64xbf16> to vector<32x64xbf16>
    %cst = arith.constant dense<0.000000e+00> : vector<16x64xf32>
    %6 = tpu.matmul %3, %5, %cst {dimension_numbers = #tpu.dot_dimension_numbers<[1], [0], [0], [1], [0, 0, 1, 1], [], []>} : vector<16x32xbf16>, vector<32x64xbf16>, vector<16x64xf32> -> vector<16x64xf32>
    %c0_5 = arith.constant 0 : index
    %c0_6 = arith.constant 0 : index
    %c0_7 = arith.constant 0 : index
    %7 = vector.load %arg5[%c0_5, %c0_6, %c0_7] : memref<1x1x64xf32, #tpu.memory_space<vmem>>, vector<1x1x64xf32>
    %8 = vector.shape_cast %7 : vector<1x1x64xf32> to vector<1x64xf32>
    %9 = vector.broadcast %8 : vector<1x64xf32> to vector<16x64xf32>
    %10 = arith.addf %6, %9 : vector<16x64xf32>
    %c0_8 = arith.constant 0 : index
    %c0_9 = arith.constant 0 : index
    %c0_10 = arith.constant 0 : index
    %11 = vector.load %arg6[%c0_8, %c0_9, %c0_10] : memref<1x32x32xbf16, #tpu.memory_space<vmem>>, vector<1x32x32xbf16>
    %12 = vector.shape_cast %11 : vector<1x32x32xbf16> to vector<32x32xbf16>
    %cst_11 = arith.constant dense<0.000000e+00> : vector<16x32xf32>
    %13 = tpu.matmul %3, %12, %cst_11 {dimension_numbers = #tpu.dot_dimension_numbers<[1], [0], [0], [1], [0, 0, 1, 1], [], []>} : vector<16x32xbf16>, vector<32x32xbf16>, vector<16x32xf32> -> vector<16x32xf32>
    %14 = arith.index_cast %arg1 : i32 to index
    %15 = memref.load %arg2[%14] : memref<4xf32, #tpu.memory_space<smem>>
    %16 = vector.extract_strided_slice %10 {offsets = [0, 0], sizes = [8, 16], strides = [1, 1]} : vector<16x64xf32> to vector<8x16xf32>
    %17 = arith.truncf %16 : vector<8x16xf32> to vector<8x16xbf16>
    %18 = vector.extract_strided_slice %10 {offsets = [0, 16], sizes = [8, 16], strides = [1, 1]} : vector<16x64xf32> to vector<8x16xf32>
    %19 = arith.truncf %18 : vector<8x16xf32> to vector<8x16xbf16>
    %20 = vector.extract_strided_slice %10 {offsets = [0, 32], sizes = [8, 16], strides = [1, 1]} : vector<16x64xf32> to vector<8x16xf32>
    %21 = arith.truncf %20 : vector<8x16xf32> to vector<8x16xbf16>
    %22 = vector.extract_strided_slice %10 {offsets = [0, 48], sizes = [8, 16], strides = [1, 1]} : vector<16x64xf32> to vector<8x16xf32>
    %23 = arith.truncf %22 : vector<8x16xf32> to vector<8x16xbf16>
    %24 = vector.extract_strided_slice %13 {offsets = [0, 0], sizes = [8, 32], strides = [1, 1]} : vector<16x32xf32> to vector<8x32xf32>
    %25 = arith.truncf %24 : vector<8x32xf32> to vector<8x32xbf16>
    %cst_12 = arith.constant dense<0.000000e+00> : vector<8x8xf32>
    %26 = tpu.matmul %17, %21, %cst_12 {dimension_numbers = #tpu.dot_dimension_numbers<[1], [1], [0], [0], [0, 0, 1, 0], [], []>} : vector<8x16xbf16>, vector<8x16xbf16>, vector<8x8xf32> -> vector<8x8xf32>
    %cst_13 = arith.constant dense<0.000000e+00> : vector<8x8xf32>
    %27 = tpu.matmul %19, %23, %cst_13 {dimension_numbers = #tpu.dot_dimension_numbers<[1], [1], [0], [0], [0, 0, 1, 0], [], []>} : vector<8x16xbf16>, vector<8x16xbf16>, vector<8x8xf32> -> vector<8x8xf32>
    %cst_14 = arith.constant dense<0xFF800000> : vector<8xf32>
    %28 = vector.multi_reduction <maximumf>, %26, %cst_14 [1] : vector<8x8xf32> to vector<8xf32>
    %29 = vector.shape_cast %28 : vector<8xf32> to vector<8x1xf32>
    %30 = vector.broadcast %29 : vector<8x1xf32> to vector<8x8xf32>
    %31 = arith.subf %26, %30 : vector<8x8xf32>
    %32 = math.exp %31 : vector<8x8xf32>
    %cst_15 = arith.constant dense<0xFF800000> : vector<8xf32>
    %33 = vector.multi_reduction <maximumf>, %27, %cst_15 [1] : vector<8x8xf32> to vector<8xf32>
    %34 = vector.shape_cast %33 : vector<8xf32> to vector<8x1xf32>
    %35 = vector.broadcast %34 : vector<8x1xf32> to vector<8x8xf32>
    %36 = arith.subf %27, %35 : vector<8x8xf32>
    %37 = math.exp %36 : vector<8x8xf32>
    %cst_16 = arith.constant dense<0.000000e+00> : vector<8xf32>
    %38 = vector.multi_reduction <add>, %32, %cst_16 [1] : vector<8x8xf32> to vector<8xf32>
    %39 = vector.shape_cast %38 : vector<8xf32> to vector<8x1xf32>
    %40 = tpu.reciprocal %39 {approx = true} : vector<8x1xf32> -> vector<8x1xf32>
    %cst_17 = arith.constant dense<0.000000e+00> : vector<8xf32>
    %41 = vector.multi_reduction <add>, %37, %cst_17 [1] : vector<8x8xf32> to vector<8xf32>
    %42 = vector.shape_cast %41 : vector<8xf32> to vector<8x1xf32>
    %43 = tpu.reciprocal %42 {approx = true} : vector<8x1xf32> -> vector<8x1xf32>
    %44 = vector.broadcast %15 : f32 to vector<8x1xf32>
    %45 = arith.mulf %44, %43 : vector<8x1xf32>
    %46 = vector.broadcast %40 : vector<8x1xf32> to vector<8x8xf32>
    %47 = arith.mulf %32, %46 : vector<8x8xf32>
    %48 = vector.broadcast %45 : vector<8x1xf32> to vector<8x8xf32>
    %49 = arith.mulf %37, %48 : vector<8x8xf32>
    %50 = arith.subf %47, %49 : vector<8x8xf32>
    %c0_18 = arith.constant 0 : index
    %c0_19 = arith.constant 0 : index
    %51 = vector.load %arg9[%c0_18, %c0_19] : memref<16x32xf32, #tpu.memory_space<vmem>>, vector<8x32xf32>
    %52 = arith.truncf %50 : vector<8x8xf32> to vector<8x8xbf16>
    %cst_20 = arith.constant dense<0.000000e+00> : vector<8x32xf32>
    %53 = tpu.matmul %52, %25, %cst_20 {dimension_numbers = #tpu.dot_dimension_numbers<[1], [0], [0], [1], [0, 0, 1, 1], [], []>} : vector<8x8xbf16>, vector<8x32xbf16>, vector<8x32xf32> -> vector<8x32xf32>
    %54 = arith.addf %51, %53 : vector<8x32xf32>
    %c0_21 = arith.constant 0 : index
    %c0_22 = arith.constant 0 : index
    %55 = vector.load %arg9[%c0_21, %c0_22] : memref<16x32xf32, #tpu.memory_space<vmem>>, vector<8x32xf32>
    tpu.vector_store %arg9[%c0_21, %c0_22], %54 {strides = array<i32>} : memref<16x32xf32, #tpu.memory_space<vmem>>, vector<8x32xf32>,
    %56 = vector.extract_strided_slice %10 {offsets = [8, 0], sizes = [8, 16], strides = [1, 1]} : vector<16x64xf32> to vector<8x16xf32>
    %57 = arith.truncf %56 : vector<8x16xf32> to vector<8x16xbf16>
    %58 = vector.extract_strided_slice %10 {offsets = [8, 16], sizes = [8, 16], strides = [1, 1]} : vector<16x64xf32> to vector<8x16xf32>
    %59 = arith.truncf %58 : vector<8x16xf32> to vector<8x16xbf16>
    %60 = vector.extract_strided_slice %10 {offsets = [8, 32], sizes = [8, 16], strides = [1, 1]} : vector<16x64xf32> to vector<8x16xf32>
    %61 = arith.truncf %60 : vector<8x16xf32> to vector<8x16xbf16>
    %62 = vector.extract_strided_slice %10 {offsets = [8, 48], sizes = [8, 16], strides = [1, 1]} : vector<16x64xf32> to vector<8x16xf32>
    %63 = arith.truncf %62 : vector<8x16xf32> to vector<8x16xbf16>
    %64 = vector.extract_strided_slice %13 {offsets = [8, 0], sizes = [8, 32], strides = [1, 1]} : vector<16x32xf32> to vector<8x32xf32>
    %65 = arith.truncf %64 : vector<8x32xf32> to vector<8x32xbf16>
    %cst_23 = arith.constant dense<0.000000e+00> : vector<8x8xf32>
    %66 = tpu.matmul %57, %61, %cst_23 {dimension_numbers = #tpu.dot_dimension_numbers<[1], [1], [0], [0], [0, 0, 1, 0], [], []>} : vector<8x16xbf16>, vector<8x16xbf16>, vector<8x8xf32> -> vector<8x8xf32>
    %cst_24 = arith.constant dense<0.000000e+00> : vector<8x8xf32>
    %67 = tpu.matmul %59, %63, %cst_24 {dimension_numbers = #tpu.dot_dimension_numbers<[1], [1], [0], [0], [0, 0, 1, 0], [], []>} : vector<8x16xbf16>, vector<8x16xbf16>, vector<8x8xf32> -> vector<8x8xf32>
    %cst_25 = arith.constant dense<0xFF800000> : vector<8xf32>
    %68 = vector.multi_reduction <maximumf>, %66, %cst_25 [1] : vector<8x8xf32> to vector<8xf32>
    %69 = vector.shape_cast %68 : vector<8xf32> to vector<8x1xf32>
    %70 = vector.broadcast %69 : vector<8x1xf32> to vector<8x8xf32>
    %71 = arith.subf %66, %70 : vector<8x8xf32>
    %72 = math.exp %71 : vector<8x8xf32>
    %cst_26 = arith.constant dense<0xFF800000> : vector<8xf32>
    %73 = vector.multi_reduction <maximumf>, %67, %cst_26 [1] : vector<8x8xf32> to vector<8xf32>
    %74 = vector.shape_cast %73 : vector<8xf32> to vector<8x1xf32>
    %75 = vector.broadcast %74 : vector<8x1xf32> to vector<8x8xf32>
    %76 = arith.subf %67, %75 : vector<8x8xf32>
    %77 = math.exp %76 : vector<8x8xf32>
    %cst_27 = arith.constant dense<0.000000e+00> : vector<8xf32>
    %78 = vector.multi_reduction <add>, %72, %cst_27 [1] : vector<8x8xf32> to vector<8xf32>
    %79 = vector.shape_cast %78 : vector<8xf32> to vector<8x1xf32>
    %80 = tpu.reciprocal %79 {approx = true} : vector<8x1xf32> -> vector<8x1xf32>
    %cst_28 = arith.constant dense<0.000000e+00> : vector<8xf32>
    %81 = vector.multi_reduction <add>, %77, %cst_28 [1] : vector<8x8xf32> to vector<8xf32>
    %82 = vector.shape_cast %81 : vector<8xf32> to vector<8x1xf32>
    %83 = tpu.reciprocal %82 {approx = true} : vector<8x1xf32> -> vector<8x1xf32>
    %84 = vector.broadcast %15 : f32 to vector<8x1xf32>
    %85 = arith.mulf %84, %83 : vector<8x1xf32>
    %86 = vector.broadcast %80 : vector<8x1xf32> to vector<8x8xf32>
    %87 = arith.mulf %72, %86 : vector<8x8xf32>
    %88 = vector.broadcast %85 : vector<8x1xf32> to vector<8x8xf32>
    %89 = arith.mulf %77, %88 : vector<8x8xf32>
    %90 = arith.subf %87, %89 : vector<8x8xf32>
    %c8 = arith.constant 8 : index
    %c0_29 = arith.constant 0 : index
    %91 = vector.load %arg9[%c8, %c0_29] : memref<16x32xf32, #tpu.memory_space<vmem>>, vector<8x32xf32>
    %92 = arith.truncf %90 : vector<8x8xf32> to vector<8x8xbf16>
    %cst_30 = arith.constant dense<0.000000e+00> : vector<8x32xf32>
    %93 = tpu.matmul %92, %65, %cst_30 {dimension_numbers = #tpu.dot_dimension_numbers<[1], [0], [0], [1], [0, 0, 1, 1], [], []>} : vector<8x8xbf16>, vector<8x32xbf16>, vector<8x32xf32> -> vector<8x32xf32>
    %94 = arith.addf %91, %93 : vector<8x32xf32>
    %c8_31 = arith.constant 8 : index
    %c0_32 = arith.constant 0 : index
    %95 = vector.load %arg9[%c8_31, %c0_32] : memref<16x32xf32, #tpu.memory_space<vmem>>, vector<8x32xf32>
    tpu.vector_store %arg9[%c8_31, %c0_32], %94 {strides = array<i32>} : memref<16x32xf32, #tpu.memory_space<vmem>>, vector<8x32xf32>,
    %c3_i32 = arith.constant 3 : i32
    %96 = arith.cmpi eq, %arg1, %c3_i32 : i32
    %97 = arith.extui %96 : i1 to i32
    %c0_i32_33 = arith.constant 0 : i32
    %98 = arith.cmpi ne, %97, %c0_i32_33 : i32
    scf.if %98 {
      %c0_34 = arith.constant 0 : index
      %c0_35 = arith.constant 0 : index
      %99 = vector.load %arg9[%c0_34, %c0_35] : memref<16x32xf32, #tpu.memory_space<vmem>>, vector<16x32xf32>
      %c0_36 = arith.constant 0 : index
      %c0_37 = arith.constant 0 : index
      %100 = vector.load %arg7[%c0_36, %c0_37] : memref<1x32xf32, #tpu.memory_space<vmem>>, vector<1x32xf32>
      %101 = vector.broadcast %100 : vector<1x32xf32> to vector<16x32xf32>
      %102 = arith.addf %99, %101 : vector<16x32xf32>
      %103 = arith.truncf %102 : vector<16x32xf32> to vector<16x32xbf16>
      %c0_38 = arith.constant 0 : index
      %c0_39 = arith.constant 0 : index
      %104 = vector.load %arg8[%c0_38, %c0_39] : memref<16x32xbf16, #tpu.memory_space<vmem>>, vector<16x32xbf16>
      tpu.vector_store %arg8[%c0_38, %c0_39], %103 {strides = array<i32>} : memref<16x32xbf16, #tpu.memory_space<vmem>>, vector<16x32xbf16>,
    } else {
    }
    return
  }
  func.func @transform_0(%arg0: i32, %arg1: i32) -> i32 {
    %c0_i32 = arith.constant 0 : i32
    %c0_i32_0 = arith.constant 0 : i32
    return %c0_i32 : i32
  }
  func.func @transform_1(%arg0: i32, %arg1: i32) -> (i32, i32) {
    %c0_i32 = arith.constant 0 : i32
    %c0_i32_0 = arith.constant 0 : i32
    return %arg0, %c0_i32 : i32, i32
  }
  func.func @transform_2(%arg0: i32, %arg1: i32) -> (i32, i32, i32) {
    %c0_i32 = arith.constant 0 : i32
    %c0_i32_0 = arith.constant 0 : i32
    %c0_i32_1 = arith.constant 0 : i32
    return %arg1, %c0_i32, %c0_i32_0 : i32, i32, i32
  }
  func.func @transform_3(%arg0: i32, %arg1: i32) -> (i32, i32, i32) {
    %c0_i32 = arith.constant 0 : i32
    %c0_i32_0 = arith.constant 0 : i32
    %c0_i32_1 = arith.constant 0 : i32
    return %arg1, %c0_i32, %c0_i32_0 : i32, i32, i32
  }
  func.func @transform_4(%arg0: i32, %arg1: i32) -> (i32, i32, i32) {
    %c0_i32 = arith.constant 0 : i32
    %c0_i32_0 = arith.constant 0 : i32
    %c0_i32_1 = arith.constant 0 : i32
    return %arg1, %c0_i32, %c0_i32_0 : i32, i32, i32
  }
  func.func @transform_5(%arg0: i32, %arg1: i32) -> (i32, i32) {
    %c0_i32 = arith.constant 0 : i32
    %c0_i32_0 = arith.constant 0 : i32
    %c0_i32_1 = arith.constant 0 : i32
    return %c0_i32, %c0_i32_0 : i32, i32
  }
  func.func @transform_6(%arg0: i32, %arg1: i32) -> (i32, i32) {
    %c0_i32 = arith.constant 0 : i32
    %c0_i32_0 = arith.constant 0 : i32
    return %arg0, %c0_i32 : i32, i32
  }
}

</mosaic_0001>

<bundles_post_ra>
// kernel: tpu_custom_call.1
= control target key start
LH: loop header
LB: loop body
LE: loop exit
PB: predicated region body
PF: predicated region fallthrough
CT: control target
= control target key end

     0   :  { %11 = vsyncpa [#allocation6], 0  ;;  %s1746_s0 = inlined_call_operand.hbm [shape: f32[4], index: 0, kind: input, shape index: {}]   ;;  %s1747_s1 = inlined_call_operand.hbm [shape: bf16[16,32], index: 1, kind: input, shape index: {}]   ;;  %s1748_s2 = inlined_call_operand.hbm [shape: bf16[4,32,64], index: 2, kind: input, shape index: {}]   ;;  %s1749_s3 = inlined_call_operand.vmem [shape: f32[4,1,64], index: 3, kind: input, shape index: {}]   ;;  %s1750_s4 = inlined_call_operand.hbm [shape: bf16[4,32,32], index: 4, kind: input, shape index: {}]   ;;  %s1751_s5 = inlined_call_operand.vmem [shape: f32[1,32], index: 5, kind: input, shape index: {}]   ;;  %s1752_s6 = inlined_call_operand.hbm [shape: bf16[16,32], index: 6, kind: output, shape index: {}]  }
   0x1   :  { %12 = vsyncpa [#allocation4], 0 }
   0x2   :  { %13 = vsyncpa [#allocation9], 0 }
   0x3   :  { %15 = vsyncpa [#allocation9 + $0x1], 0 }
   0x4   :  { %16 = vsyncpa [#allocation5], 0  ;;  %s1475_s21 = smov 0   ;;  %s1477_s22 = smov 0  }
   0x5   :  { %s1479_s23 = smov 0   ;;  %s1481_s24 = smov 0  }
   0x6   :  { %s1483_s25 = smov 0   ;;  %s1485_s26 = smov 0  }
   0x7 LB: > { %s31_s27 = sadd.s32 1, %s1419_s25  ;;  %s88_s28 = sadd.s32 1, %s1411_s23  ;;  %s1423_s26 = sphi %s1485_s26, %s22_s26   ;;  %s1419_s25 = sphi %s1483_s25, %s1762_s25   ;;  %s1415_s24 = sphi %s1481_s24, %s1761_s24   ;;  %s1411_s23 = sphi %s1479_s23, %s1760_s23   ;;  %s1407_s22 = sphi %s1477_s22, %s1759_s22   ;;  %s1403_s21 = sphi %s1475_s21, %s1758_s21  }
   0x8   : > { %p32_p0 = scmp.ge.s32.totalorder %s31_s27, 4  ;;  %p95_p1 = scmp.ne.s32.totalorder %s1411_s23, %s1407_s22 }
   0x9   : > { %p96_p2 = scmp.eq.s32.totalorder %s1423_s26, 0  ;;  %p1157_p5 = scmp.lt.s32.totalorder %s1423_s26, 4 }
   0xa   : > { %s1764_s27 = smov (%p32_p0, %s31_s27), 0  ;;  %s252_s7 = sand.u32 1, %s1423_s26  }
   0xb   : > { %p1512_p3 = por %p96_p2, %p95_p1  ;;  %s85_s30 = ssub.s32 %s1419_s25, %s1764_s27 }
   0xc   : > { %p86_p4 = scmp.eq.s32.totalorder %s85_s30, 0  ;;  %s254_s8 = sand.u32 1, %s1411_s23  }
   0xd   : > { %s1524_s10 = sshll.u32 %s254_s8, 4  ;;  %s1051_s11 = sshll.u32 %s1419_s25, 8 }
   0xe   : > { %s1522_s9 = scalar_select %p86_p4, %s1411_s23, %s88_s28  }
   0xf   : > { %s262_s14 = scalar_lea.hbm %s1748_s2, %s1051_s11  ;;  %s256_s15 = scalar_lea.vmem [#allocation8], %s1524_s10 }
  0x10   : > { %s263_s16 = sshll.u32 %s256_s15, 4  ;;  %p1535_p6 = pnand %p1157_p5, %p1512_p3  ;;  %s264_s16 = int_to_ptr.vmem [resolvable:$true] %s263_s16 }
  0x11   : > { %s1539_s18 = scalar_lea.sflag [#allocation9], %s252_s7  ;;  %s1257_s19 = scalar_lea.vmem %s264_s16, 256 }
  0x12   : > { %p1246_p7 = pneg %p1535_p6  ;;  %p1258_p8 = scmp.ne.s32.totalorder %s264_s16, %s1257_s19 }
  0x13   : > { %s1425_s20 = smov [#allocation8]  }
  0x14   : > { %p1260_p9 = pnand %p1258_p8, %p1246_p7  ;;  %s1262_s28 = sshll.u32 %s1425_s20, 4  ;;  %s1263_s28 = int_to_ptr.vmem [resolvable:$false] %s1262_s28 }
  0x15   : > { %s1264_s29 = scalar_lea.vmem %s1263_s28, 512  ;;  %p1265_p11 = scmp.lt.s32.totalorder %s264_s16, %s1263_s28 }
  0x16   : > { %p1261_p10 = pneg %p1260_p9  ;;  %p1266_p12 = scmp.lt.s32.totalorder %s1264_s29, %s1257_s19 }
  0x18   : > { %p1267_p13 = por %p1266_p12, %p1265_p11 }
  0x1a   : > { %p1268_p0 = pnand %p1267_p13, %p1261_p10 }
  0x1c   : > { %1271 = shalt.err (!%p1268_p0)
}
  0x1d   : > { %s1426_s30 = smov 64   ;;  %s1427_s7 = smov 4  }
  0x1e   : > { %1151 = dma.hbm_to_vmem [thread:$0]  (!%p1535_p6), %s262_s14, 256, %s264_s16, %s1539_s18, %s1426_s30, %s1426_s30, %s1427_s7  }
  0x1f   : > { %s283_s8 = scalar_lea.vmem [#allocation10], %s1524_s10  ;;  %s1554_s13 = sadd.s32 4294967295, %s1423_s26  }
  0x20   : > { %s290_s12 = sshll.u32 %s283_s8, 4  ;;  %p101_p1 = scmp.ne.s32.totalorder %s1407_s22, %s1403_s21  ;;  %s291_s12 = int_to_ptr.vmem [resolvable:$true] %s290_s12 }
  0x21   : > { %p102_p2 = scmp.eq.s32.totalorder %s1554_s13, 0  ;;  %p1013_p3 = scmp.ge.s32.totalorder %s1423_s26, 1 }
  0x22   : > { %p211_p4 = scmp.lt.s32.totalorder %s1423_s26, 5  ;;  %s289_s10 = scalar_lea.hbm %s1750_s4, %s1051_s11 }
  0x23   : > { %p1563_p5 = por %p102_p2, %p101_p1  ;;  %s1428_s21 = smov [#allocation7]  }
  0x24   : > { %p1572_p8 = pnand %p1013_p3, %p211_p4  ;;  %s235_s20 = sshll.u32 %s1428_s21, 4  ;;  %s1584_s20 = int_to_ptr.vmem [resolvable:$true] %s235_s20 }
  0x25   : > { %s1285_s29 = scalar_lea.vmem %s291_s12, 256  ;;  %s1429_s11 = smov [#allocation10]  }
  0x26   : > { %p1141_p9 = pneg %p1572_p8  ;;  %p1286_p11 = scmp.ne.s32.totalorder %s291_s12, %s1285_s29 }
  0x27   : > { %s1290_s8 = sshll.u32 %s1429_s11, 4  ;;  %s1291_s8 = int_to_ptr.vmem [resolvable:$false] %s1290_s8 }
  0x28   : > { %p1580_p10 = pnand %p1141_p9, %p102_p2  ;;  %p1288_p12 = pnand %p1286_p11, %p1246_p7 }
  0x29   : > { %s1292_s19 = scalar_lea.vmem %s1291_s8, 512  ;;  %p1293_p0 = scmp.lt.s32.totalorder %s291_s12, %s1291_s8 }
  0x2a   : > { %p1289_p13 = pneg %p1288_p12  ;;  %p1294_p1 = scmp.lt.s32.totalorder %s1292_s19, %s1285_s29 }
  0x2c   : > { %p1295_p3 = por %p1294_p1, %p1293_p0 }
  0x2e   : > { %p1296_p4 = pnand %p1295_p3, %p1289_p13 }
  0x30   : > { %1299 = shalt.err (!%p1296_p4)
}
  0x31   : > { %1154 = dma.hbm_to_vmem [thread:$0]  (!%p1535_p6), %s289_s10, 256, %s291_s12, %s1539_s18, %s1426_s30, %s1426_s30, %s1427_s7  }
  0x32   : > { %s1430_s14 = smov [#allocation3]   ;;  %p1313_p7 = pneg %p1580_p10 }
  0x33   : > { %1144 = dma.hbm_to_smem (!%p1580_p10), %s1746_s0, 16, %s1430_s14, [#allocation6]  }
  0x34   : > { %s1322_s29 = scalar_lea.vmem %s1584_s20, 128  ;;  %p1330_p13 = scmp.lt.s32.totalorder %s1584_s20, %s1584_s20 }
  0x35   : > { %p1323_p9 = scmp.ne.s32.totalorder %s1584_s20, %s1322_s29  ;;  %p1331_p0 = scmp.lt.s32.totalorder %s1322_s29, %s1322_s29 }
  0x37   : > { %p1325_p11 = pnand %p1323_p9, %p1313_p7  ;;  %p1332_p1 = por %p1331_p0, %p1330_p13 }
  0x39   : > { %p1326_p12 = pneg %p1325_p11 }
  0x3b   : > { %p1333_p3 = pnand %p1332_p1, %p1326_p12 }
  0x3d   : > { %1336 = shalt.err (!%p1333_p3)
}
  0x3e   : > { %1147 = dma.hbm_to_vmem [thread:$0]  (!%p1580_p10), %s1747_s1, 128, %s1584_s20, [#allocation4], %s1426_s30, %s1426_s30, %s1427_s7  }
  0x3f   : > { %302 = sbr.rel (%p1572_p8) target bundleno = 1674 (0x68a), region = 44 }
  0x44   : > { %1386 = dma.done.wait (%p102_p2), [#allocation6], 16  }
  0x45   : > { %1388 = vsyncadd (%p102_p2), [#allocation6], 4294967280 }
  0x46   : > { %1390 = dma.done.wait (%p102_p2), [#allocation4], 128  }
  0x47   : > { %1392 = vsyncadd (%p102_p2), [#allocation4], 4294967168  ;;  %s312_s12 = sand.u32 1, %s1554_s13   ;;  %s314_s30 = sand.u32 1, %s1407_s22  }
  0x48   : > { %s1627_s7 = sshll.u32 %s314_s30, 4  ;;  %s313_s10 = scalar_lea.sflag [#allocation9], %s312_s12 }
  0x49   : > { %s316_s16 = scalar_lea.vmem [#allocation8], %s1627_s7 }
  0x4a   : > { %1394 = dma.done.wait (%p1563_p5), %s313_s10, 512  }
  0x4b   : > { %1396 = vsyncadd (%p1563_p5), %s313_s10, 4294966784  ;;  %s325_s20 = scalar_lea.vmem [#allocation10], %s1627_s7 }
  0x4c   : > { %330 = sfence }
  0x4d   : > { %p359_p6 = scmp.lt.s32.totalorder %s1415_s24, 3  ;;  %p1028_p2 = scmp.ne.s32.totalorder %s1415_s24, 0 }
  0x4f   : > { %s1637_s28 = scalar_select %p359_p6, %s1415_s24, 3 }
  0x50   : > { %367 = sbr.rel (%p1028_p2) target bundleno = 87 (0x57), region = 64 }
  0x51   : > { %s361_s14 = scalar_lea.vmem %s1749_s3, %s1637_s28 }
  0x55   : > { %vm368_vm0 = vcmask 261120   ;;  %v1431_v0 = vmov 0.0  }
  0x56   : > { %369 = vst.msk [vmem:[#allocation2] sm:$0xff] %vm368_vm0, %v1431_v0  ;;  %370 = vst.msk [vmem:[#allocation2 + $0x8] sm:$0xff] %vm368_vm0, %v1431_v0 }
  0x57 PF: > { %v1223_v1 = vld [vmem:[%s316_s16 + $0x8] sm:$0xff]   ;;  %v1432_v2 = vmov 0.0   ;;  %v1224_v3 = vld [vmem:[%s316_s16] sm:$0xff]   ;;  %vm1433_vm1 = vmmov 0   ;;  %vm401_vm2 = vcmask 261120   ;;  %s1434_s11 = smov 112  }
  0x58   : > { %1073 = vmatprep.subr.bf16.mxu0 %v1432_v2  ;;  %1081 = vmatprep.subr.bf16.mxu1 %v1432_v2  ;;  %v1225_v4 = vld [vmem:[#allocation7] sm:$0xff]   ;;  %v1227_v6 = vld [vmem:[%s325_s20] sm:$0xff]   ;;  %v1029_v7 = vld [vmem:[%s361_s14] ss:$0 sm:$0xff]  ;;  %s1435_s29 = smov 80   ;;  %s1436_s17 = smov 96  }
  0x59   : > { %1074 = vmatpush3.bf16.msra.mxu0 %v1223_v1  ;;  %1077 = vmatprep.mubr.msk.bf16.mxu0 %vm1433_vm1, %v1432_v2  ;;  %v1226_v5 = vld [vmem:[%s325_s20 + $0x8] sm:$0xff]   ;;  %vm637_vm3 = vcmask 1043456   ;;  %vm509_vm4 = vcmask 130048   ;;  %vm606_vm5 = vcmask 64512   ;;  %s1691_s18 = sld [smem:[#allocation3 + %s1415_s24]]  ;;  %p1043_p5 = scmp.ne.s32.totalorder %s1415_s24, 3 }
  0x5a   : > { %1075 = vmatprep.subr.bf16.mxu0 %v1432_v2  ;;  %1085 = vmatprep.mubr.msk.bf16.mxu1 %vm1433_vm1, %v1432_v2 }
  0x5b   : > { %1082 = vmatpush3.bf16.msra.mxu1 %v1226_v5 }
  0x5c   : > { %1083 = vmatprep.subr.bf16.mxu1 %v1432_v2 }
  0x5d   : > { %1076 = vmatpush3.bf16.msra.mxu0 %v1224_v3 }
  0x5e   : > { %1089 = vmatprep.subr.bf16.mxu0 %v1432_v2 }
  0x5f   : > { %1084 = vmatpush3.bf16.msra.mxu1 %v1227_v6  ;;  %v627_v53 = vstv %s1691_s18  ;;  %v632_v6 = vld [vmem:[#allocation2] sm:$0xff] }
  0x60   : > { %1078 = vmatmul.mubr.msk.bf16.vlgmr.msra.gmra.mxu0 %vm401_vm2, %v1225_v4  ;;  %1095 = vmatprep.subr.bf16.mxu1 %v1432_v2 }
  0x61   : > { %1091 = vmatprep.mubr.msk.bf16.mxu0 %vm1433_vm1, %v1432_v2 }
  0x62   : > { %1086 = vmatmul.mubr.msk.bf16.vlgmr.msra.gmra.mxu1 %vm401_vm2, %v1225_v4 }
  0x63   : > { %1097 = vmatprep.mubr.msk.bf16.mxu1 %vm1433_vm1, %v1432_v2 }
 0x120   : > { %v439_v8 = vpop.f32.mrf.mxu0 }
 0x121   : > { %v440_v9 = vadd.f32 %v1029_v7, %v439_v8 }
 0x122   : > { %v1079_v10 = vpop.f32.mrf.mxu0  ;;  %v496_v15 = vpop.f32.mrf.mxu1 }
 0x123   : > { %v504_v11 = vpack.c.bf16 %v440_v9, %v440_v9  ;;  %v505_v25 = vpack.c.bf16 %v496_v15, %v496_v15 }
 0x124   : > { %v442_v12 = vpop.f32.mrf.mxu0  ;;  %v1087_v16 = vpop.f32.mrf.mxu1 }
 0x125   : > { %v443_v13 = vadd.f32 %v1029_v7, %v442_v12  ;;  %556 = vrot.lane.b32.xlu1 %v504_v11, %s1434_s11  ;;  %558 = vrot.lane.b32.xlu0 %v504_v11, %s1435_s29  ;;  %v639_v27 = vsel %vm637_vm3, %v505_v25, 0 }
 0x126   : > { %v1080_v14 = vpop.f32.mrf.mxu0  ;;  %v499_v17 = vpop.f32.mrf.mxu1 }
 0x127   : > { %v684_v18 = vpack.c.bf16 %v499_v17, %v499_v17  ;;  %v683_v48 = vpack.c.bf16 %v443_v13, %v443_v13 }
 0x128   : > { %v1088_v19 = vpop.f32.mrf.mxu1 }
 0x129   : > { %507 = vrot.lane.b32.xlu0 %v504_v11, %s1436_s17  ;;  %v1669_v20 = vsel %vm637_vm3, %v684_v18, 0 }
 0x197   : > { %v559_v21 = vpop.permute.xlu0 %558  ;;  %v557_v26 = vpop.permute.xlu1 %556 }
 0x198   : > { %v564_v22 = vsel %vm509_vm4, %v559_v21, 0 }
 0x199   : > { %1096 = vmatpush3.bf16.xpose.msra.mxu1 %v564_v22 }
 0x19a   : > { %1107 = vmatprep.subr.bf16.mxu1 %v1432_v2 }
 0x19b   : > { %v508_v23 = vpop.permute.xlu0 %507 }
 0x19c   : > { %v514_v24 = vsel %vm509_vm4, %v508_v23, 0 }
 0x19d   : > { %1090 = vmatpush3.bf16.xpose.msra.mxu0 %v514_v24 }
 0x19e   : > { %1101 = vmatprep.subr.bf16.mxu0 %v1432_v2 }
 0x1a0   : > { %1098 = vmatmul.mubr.msk.bf16.vlgmr.msra.gmra.mxu1 %vm509_vm4, %v557_v26 }
 0x1a1   : > { %1109 = vmatprep.mubr.msk.bf16.mxu1 %vm1433_vm1, %v1432_v2 }
 0x1a4   : > { %1092 = vmatmul.mubr.msk.bf16.vlgmr.msra.gmra.mxu0 %vm509_vm4, %v504_v11 }
 0x1a5   : > { %1102 = vmatpush3.bf16.msra.mxu0 %v639_v27  ;;  %1103 = vmatprep.mubr.msk.bf16.mxu0 %vm1433_vm1, %v1432_v2 }
 0x1a6   : > { %1113 = vmatprep.subr.bf16.mxu0 %v1432_v2 }
 0x260   : > { %v600_v28 = vpop.f32.mrf.mxu1 }
 0x261   : > { %v613_v29 = vsel %vm606_vm5, %v600_v28, -inf }
 0x262   : > { %614 = vmax.xlane.f32.xlu1 %v613_v29  ;;  %v1099_v30 = vpop.f32.mrf.mxu1 }
 0x264   : > { %v550_v31 = vpop.f32.mrf.mxu0  ;;  %v603_v32 = vpop.f32.mrf.mxu1 }
 0x265   : > { %v607_v33 = vsel %vm606_vm5, %v550_v31, -inf }
 0x266   : > { %v1100_v34 = vpop.f32.mrf.mxu1  ;;  %608 = vmax.xlane.f32.xlu0 %v607_v33  ;;  %v1093_v35 = vpop.f32.mrf.mxu0 }
 0x267   : > { %v808_v35 = vld [vmem:[#allocation2 + $0x8] sm:$0xff] }
 0x268   : > { %v553_v36 = vpop.f32.mrf.mxu0 }
 0x26a   : > { %v1094_v37 = vpop.f32.mrf.mxu0 }
 0x2eb   : > { %v615_v38 = vpop.xlane.xlu1 %614 }
 0x2ec   : > { %v616_v39 = vsub.f32 %v600_v28, %v615_v38 }
 0x2ee   : > { %v617_v40 = vmul.f32 1.442695, %v616_v39 }
 0x2ef   : > { %v609_v41 = vpop.xlane.xlu0 %608 }
 0x2f0   : > { %1228 = vpow2.f32 %v617_v40  ;;  %v610_v42 = vsub.f32 %v550_v31, %v609_v41 }
 0x2f2   : > { %v611_v43 = vmul.f32 1.442695, %v610_v42 }
 0x2f4   : > { %1230 = vpow2.f32 %v611_v43 }
 0x2fd   : > { %v1229_v44 = vpop.eup %1228 }
 0x2fe   : > { %v623_v45 = vsel %vm606_vm5, %v1229_v44, 0.0 }
 0x2ff   : > { %624 = vadd.xlane.f32.xlu0 %v623_v45 }
 0x301   : > { %v1231_v46 = vpop.eup %1230 }
 0x302   : > { %v619_v47 = vsel %vm606_vm5, %v1231_v46, 0.0 }
 0x303   : > { %620 = vadd.xlane.f32.xlu1 %v619_v47 }
 0x314   : > { %686 = vrot.lane.b32.xlu1 %v683_v48, %s1436_s17 }
 0x315   : > { %736 = vrot.lane.b32.xlu0 %v683_v48, %s1435_s29 }
 0x318   : > { %734 = vrot.lane.b32.xlu1 %v683_v48, %s1434_s11 }
 0x388   : > { %v625_v49 = vpop.xlane.xlu0 %624 }
 0x389   : > { %1232 = vrcp.f32 %v625_v49 }
 0x38c   : > { %v621_v50 = vpop.xlane.xlu1 %620  ;;  %v737_v60 = vpop.permute.xlu0 %736 }
 0x38d   : > { %1234 = vrcp.f32 %v621_v50  ;;  %v742_v62 = vsel %vm509_vm4, %v737_v60, 0 }
 0x390   : > { %v687_v51 = vpop.permute.xlu1 %686 }
 0x391   : > { %v692_v52 = vsel %vm509_vm4, %v687_v51, 0 }
 0x392   : > { %1108 = vmatpush3.bf16.xpose.msra.mxu1 %v692_v52 }
 0x393   : > { %1119 = vmatprep.subr.bf16.mxu1 %v1432_v2 }
 0x394   : > { %v735_v63 = vpop.permute.xlu1 %734 }
 0x396   : > { %v1233_v54 = vpop.eup %1232 }
 0x397   : > { %v628_v55 = vmul.f32 %v1233_v54, %v627_v53 }
 0x399   : > { %1110 = vmatmul.mubr.msk.bf16.vlgmr.msra.gmra.mxu1 %vm509_vm4, %v683_v48  ;;  %v630_v58 = vmul.f32 %v1229_v44, %v628_v55 }
 0x39a   : > { %v1235_v56 = vpop.eup %1234  ;;  %1120 = vmatpush3.bf16.msra.mxu1 %v1669_v20  ;;  %1121 = vmatprep.mubr.msk.bf16.mxu1 %vm1433_vm1, %v1432_v2 }
 0x39b   : > { %v629_v57 = vmul.f32 %v1235_v56, %v1231_v46 }
 0x39d   : > { %v631_v59 = vsub.f32 %v629_v57, %v630_v58 }
 0x39f   : > { %v633_v61 = vpack.c.bf16 %v631_v59, %v631_v59 }
 0x3a1   : > { %1104 = vmatmul.mubr.msk.bf16.vlgmr.msra.gmra.mxu0 %vm606_vm5, %v633_v61 }
 0x3a2   : > { %1114 = vmatpush3.bf16.xpose.msra.mxu0 %v742_v62  ;;  %1115 = vmatprep.mubr.msk.bf16.mxu0 %vm1433_vm1, %v1432_v2 }
 0x3a9   : > { %1116 = vmatmul.mubr.msk.bf16.vlgmr.msra.gmra.mxu0 %vm509_vm4, %v735_v63 }
 0x459   : > { %v728_v0 = vpop.f32.mrf.mxu1 }
 0x45a   : > { %v784_v1 = vsel %vm606_vm5, %v728_v0, -inf }
 0x45b   : > { %785 = vmax.xlane.f32.xlu1 %v784_v1  ;;  %v1111_v3 = vpop.f32.mrf.mxu1 }
 0x45d   : > { %v731_v4 = vpop.f32.mrf.mxu1 }
 0x45f   : > { %v1112_v5 = vpop.f32.mrf.mxu1 }
 0x461   : > { %v675_v7 = vpop.f32.mrf.mxu0 }
 0x462   : > { %v681_v8 = vadd.f32 %v675_v7, %v632_v6 }
 0x463   : > { %v1105_v9 = vpop.f32.mrf.mxu0 }
 0x464   : > { %682 = vst.msk [vmem:[#allocation2] sm:$0xff] %vm401_vm2, %v681_v8 }
 0x465   : > { %v678_v10 = vpop.f32.mrf.mxu0 }
 0x467   : > { %v1106_v11 = vpop.f32.mrf.mxu0 }
 0x469   : > { %v778_v12 = vpop.f32.mrf.mxu0 }
 0x46a   : > { %v790_v2 = vsel %vm606_vm5, %v778_v12, -inf }
 0x46b   : > { %791 = vmax.xlane.f32.xlu0 %v790_v2  ;;  %v1117_v13 = vpop.f32.mrf.mxu0 }
 0x46d   : > { %v781_v14 = vpop.f32.mrf.mxu0 }
 0x46f   : > { %v1118_v15 = vpop.f32.mrf.mxu0 }
 0x4e4   : > { %v786_v16 = vpop.xlane.xlu1 %785 }
 0x4e5   : > { %v787_v17 = vsub.f32 %v728_v0, %v786_v16 }
 0x4e7   : > { %v788_v20 = vmul.f32 1.442695, %v787_v17 }
 0x4f4   : > { %v792_v18 = vpop.xlane.xlu0 %791 }
 0x4f5   : > { %v793_v19 = vsub.f32 %v778_v12, %v792_v18 }
 0x4f7   : > { %v794_v21 = vmul.f32 1.442695, %v793_v19 }
 0x4f9   : > { %1236 = vpow2.f32 %v794_v21 }
 0x4fa   : > { %1238 = vpow2.f32 %v788_v20 }
 0x506   : > { %v1237_v22 = vpop.eup %1236 }
 0x507   : > { %v800_v23 = vsel %vm606_vm5, %v1237_v22, 0.0  ;;  %v1239_v24 = vpop.eup %1238 }
 0x508   : > { %801 = vadd.xlane.f32.xlu0 %v800_v23  ;;  %v796_v25 = vsel %vm606_vm5, %v1239_v24, 0.0 }
 0x50c   : > { %797 = vadd.xlane.f32.xlu0 %v796_v25 }
 0x591   : > { %v802_v26 = vpop.xlane.xlu0 %801 }
 0x592   : > { %1240 = vrcp.f32 %v802_v26 }
 0x595   : > { %v798_v27 = vpop.xlane.xlu0 %797 }
 0x596   : > { %1242 = vrcp.f32 %v798_v27 }
 0x59f   : > { %v1241_v28 = vpop.eup %1240 }
 0x5a0   : > { %v804_v29 = vmul.f32 %v1241_v28, %v627_v53 }
 0x5a2   : > { %v806_v32 = vmul.f32 %v1237_v22, %v804_v29 }
 0x5a3   : > { %v1243_v30 = vpop.eup %1242 }
 0x5a4   : > { %v805_v31 = vmul.f32 %v1243_v30, %v1239_v24 }
 0x5a6   : > { %v807_v33 = vsub.f32 %v805_v31, %v806_v32 }
 0x5a8   : > { %v809_v34 = vpack.c.bf16 %v807_v33, %v807_v33 }
 0x5aa   : > { %1122 = vmatmul.mubr.msk.bf16.vlgmr.msra.gmra.mxu1 %vm606_vm5, %v809_v34 }
 0x66a   : > { %v850_v36 = vpop.f32.mrf.mxu1 }
 0x66b   : > { %v856_v37 = vadd.f32 %v850_v36, %v808_v35 }
 0x66c   : > { %v1123_v38 = vpop.f32.mrf.mxu1  ;;  %861 = sbr.rel (%p1043_p5) target bundleno = 1658 (0x67a), region = 68 }
 0x66d   : > { %857 = vst.msk [vmem:[#allocation2 + $0x8] sm:$0xff] %vm401_vm2, %v856_v37 }
 0x66e   : > { %v853_v39 = vpop.f32.mrf.mxu1 }
 0x670   : > { %v1124_v40 = vpop.f32.mrf.mxu1 }
 0x671   : > { %v862_v41 = vld [vmem:[#allocation2] sm:$0xff]  ;;  %vm881_vm6 = vcmask 257024  }
 0x672   : > { %v1044_v42 = vld [vmem:[%s1751_s5] ss:$0 sm:$0xff] }
 0x673   : > { %v871_v44 = vadd.f32 %v1044_v42, %v862_v41 }
 0x674   : > { %v863_v43 = vld [vmem:[#allocation2 + $0x8] sm:$0xff] }
 0x675   : > { %v872_v45 = vadd.f32 %v1044_v42, %v863_v43  ;;  %v1053_v46 = vpack.c.bf16 %v871_v44, %v871_v44 }
 0x677   : > { %v1054_v47 = vpack.c.bf16 %v872_v45, %v872_v45  ;;  %882 = vst.msk [vmem:[#allocation11] sm:$0xf] %vm881_vm6, %v1053_v46 }
 0x679   : > { %883 = vst.msk [vmem:[#allocation11 + $0x4] sm:$0xf] %vm881_vm6, %v1054_v47 }
 0x67a PF: > { %p1160_p8 = scmp.eq.s32.totalorder %s1554_s13, 3  ;;  %s1437_s7 = smov [#allocation11]  }
 0x67b   : > { %s893_s24 = sshll.u32 %s1437_s7, 4  ;;  %s894_s24 = int_to_ptr.vmem [resolvable:$true] %s893_s24 }
 0x67c   : > { %s1337_s10 = scalar_lea.vmem %s894_s24, 128  ;;  %p1344_p9 = scmp.lt.s32.totalorder %s894_s24, %s894_s24 }
 0x67d   : > { %p1338_p10 = scmp.ne.s32.totalorder %s894_s24, %s1337_s10  ;;  %p1345_p11 = scmp.lt.s32.totalorder %s1337_s10, %s1337_s10 }
 0x67f   : > { %p1339_p4 = pnand %p1338_p10, %p1160_p8  ;;  %p1346_p12 = por %p1345_p11, %p1344_p9 }
 0x681   : > { %p1340_p7 = pneg %p1339_p4 }
 0x683   : > { %p1347_p13 = pnand %p1346_p12, %p1340_p7 }
 0x685   : > { %1350 = shalt.err (!%p1347_p13)
}
 0x686   : > { %s1438_s16 = smov 64   ;;  %s1439_s20 = smov 4  }
 0x687   : > { %1138 = dma.vmem_to_hbm [thread:$0]  (%p1160_p8), %s894_s24, 128, %s1752_s6, [#allocation5], %s1438_s16, %s1438_s16, %s1439_s20  }
 0x688   : > { %1398 = dma.done.wait (%p1160_p8), [#allocation5], 128  }
 0x689   : > { %1400 = vsyncadd (%p1160_p8), [#allocation5], 4294967168 }
 0x68a PF: > { %s22_s26 = sadd.s32 1, %s1423_s26   ;;  %s1758_s21 = smov %s1407_s22 }
 0x68b   : > { %p19_p0 = scmp.ge.s32.totalorder %s22_s26, 6   ;;  %s1759_s22 = smov %s1411_s23 }
 0x68c   : > { %s1760_s23 = smov %s1522_s9  ;;  %s1761_s24 = smov %s1419_s25 }
 0x68d   : > { %s1762_s25 = smov %s1764_s27  ;;  %21 = sbr.rel (!%p19_p0) target bundleno = 7 (0x7), region = 115 }
 0x692   :  { %909 = vsyncpa [#allocation4], 1 }
 0x693   :  { %911 = vsyncpa [#allocation4 + $0x1], 1 }
 0x694   :  { %912 = vsyncpa [#allocation9], 1 }
 0x695   :  { %914 = vsyncpa [#allocation9 + $0x1], 1 }
 0x696   :  { %915 = vsyncpa [#allocation5], 1 }
 0x697   :  { %917 = vsyncpa [#allocation5 + $0x1], 1 }
 0x698   :  { %918 = vsyncpa [#allocation6], 1 }
 0x699   :  { %920 = vsyncpa [#allocation6 + $0x1], 1 }

</bundles_post_ra>
